<compile_context>
chip_gen: v6e
topology: v6e:2x2x1
jax: 0.10.0
libtpu: 0.0.40
codegen_flags: <defaults>
</compile_context>

<pallas_src>
import jax
import jax.numpy as jnp
from jax import lax
from jax.experimental import pallas as pl
from jax.experimental.pallas import tpu as pltpu


# --------------------------------------------------------------------------------------
# Pallas kernel: loss_positive + loss_negative via 1-D moments
# --------------------------------------------------------------------------------------
def _rocstar_kernel(rows_ref, cols_ref, loss_ref):
    """RocStar pair losses on packed operands.

    rows_ref: (2, B) f32 VMEM -- row 0 = outputs, row 1 = targets (batch on lanes)
    cols_ref: (S, 3) f32 VMEM -- col 0 = history outputs, col 1 = history labels,
                                  col 2 = gamma (pre-broadcast constant column)
    loss_ref: (1, 1) f32 VMEM output
    """
    out_r = rows_ref[0:1, :]                       # (1, B)
    tgt_r = rows_ref[1:2, :]                       # (1, B)
    h_c = cols_ref[:, 0:1]                         # (S, 1)
    ht_c = cols_ref[:, 1:2]                        # (S, 1)
    g_c = cols_ref[:, 2:3]                         # (S, 1) constant gamma column

    one = jnp.float32(1.0)
    # torch masks: positives are (t > 0), negatives are (t < 1) -- kept independent so
    # soft/float labels behave exactly like the torch code.
    pos_r = (tgt_r > 0.0).astype(jnp.float32)      # (1, B)
    neg_r = (tgt_r < 1.0).astype(jnp.float32)      # (1, B)
    ph_c = (ht_c > 0.0).astype(jnp.float32)        # (S, 1)
    nh_c = (ht_c < 1.0).astype(jnp.float32)        # (S, 1)

    # Batch-side moments (lane reductions over B).
    o = out_r
    po = pos_r * o
    no = neg_r * o
    n_pos = jnp.sum(pos_r, axis=1, keepdims=True)          # (1, 1)
    s_po = jnp.sum(po, axis=1, keepdims=True)
    s_po2 = jnp.sum(po * o, axis=1, keepdims=True)
    n_neg = jnp.sum(neg_r, axis=1, keepdims=True)
    s_no = jnp.sum(no, axis=1, keepdims=True)
    s_no2 = jnp.sum(no * o, axis=1, keepdims=True)

    # History-side moments (sublane reductions over S).
    a = h_c + g_c                                  # hist + gamma
    b = g_c - h_c                                  # gamma - hist
    nha = nh_c * a
    phb = ph_c * b
    n_nh = jnp.sum(nh_c, axis=0, keepdims=True)             # (1, 1)
    s_nha = jnp.sum(nha, axis=0, keepdims=True)
    s_nha2 = jnp.sum(nha * a, axis=0, keepdims=True)
    n_ph = jnp.sum(ph_c, axis=0, keepdims=True)
    s_phb = jnp.sum(phb, axis=0, keepdims=True)
    s_phb2 = jnp.sum(phb * b, axis=0, keepdims=True)

    # loss_positive: sum over (i in negative history, j in current positives) of
    # (h_i + g - o_j)^2, expanded in moments.  (relu of a square is a no-op.)
    s1 = s_nha2 * n_pos - 2.0 * s_nha * s_po + n_nh * s_po2
    c1 = n_nh * n_pos
    # loss_negative: sum over (i in positive history, j in current negatives) of
    # (o_j + g - h_i)^2 = ((g - h_i) + o_j)^2.
    s2 = s_phb2 * n_neg + 2.0 * s_phb * s_no + n_ph * s_no2
    c2 = n_ph * n_neg

    # Mean over valid pairs; zero contribution when a side is empty.
    loss_ref[...] = s1 / jnp.maximum(c1, one) + s2 / jnp.maximum(c2, one)


def _rocstar_loss_forward(outputs, targets, hist_outputs, hist_targets, gamma):
    """Builds the two packed operands and invokes the Pallas kernel."""
    B = outputs.shape[0]
    S = hist_outputs.shape[0]

    rows = jnp.concatenate(
        [outputs.astype(jnp.float32).reshape(1, B),
         targets.astype(jnp.float32).reshape(1, B)], axis=0)              # (2, B)
    gamma_col = jnp.full((S, 1), gamma, dtype=jnp.float32)                # (S, 1)
    cols = jnp.concatenate(
        [hist_outputs.astype(jnp.float32).reshape(S, 1),
         hist_targets.astype(jnp.float32).reshape(S, 1),
         gamma_col], axis=1)                                              # (S, 3)

    vmem = pl.BlockSpec(memory_space=pltpu.MemorySpace.VMEM)
    loss = pl.pallas_call(
        _rocstar_kernel,
        out_shape=jax.ShapeDtypeStruct((1, 1), jnp.float32),
        in_specs=[vmem, vmem],
        out_specs=vmem,
    )(rows, cols)
    return loss[0, 0]


def _rocstar_reference(outputs, targets, hist_outputs, hist_targets, gamma):
    """Pure-jnp masked-mean reference (direct pairwise form, torch-faithful)."""
    o = outputs.reshape(-1).astype(jnp.float32)
    t = targets.reshape(-1).astype(jnp.float32)
    h = hist_outputs.reshape(-1).astype(jnp.float32)
    ht = hist_targets.reshape(-1).astype(jnp.float32)
    pos = t > 0
    neg = t < 1
    hpos = ht > 0
    hneg = ht < 1
    d1 = h[:, None] + gamma - o[None, :]
    m1 = hneg[:, None] & pos[None, :]
    lp = jnp.sum(jnp.where(m1, d1 * d1, 0.0)) / jnp.maximum(
        jnp.sum(m1), 1).astype(jnp.float32)
    d2 = o[None, :] + gamma - h[:, None]
    m2 = hpos[:, None] & neg[None, :]
    ln = jnp.sum(jnp.where(m2, d2 * d2, 0.0)) / jnp.maximum(
        jnp.sum(m2), 1).astype(jnp.float32)
    return lp + ln


# ---- differentiable front-end (review correctness concern: training needs a VJP) ------
@jax.custom_vjp
def rocstar_loss_pallas(outputs, targets, hist_outputs, hist_targets, gamma):
    return _rocstar_loss_forward(outputs, targets, hist_outputs, hist_targets, gamma)


def _rocstar_fwd(outputs, targets, hist_outputs, hist_targets, gamma):
    loss = _rocstar_loss_forward(outputs, targets, hist_outputs, hist_targets, gamma)
    return loss, (outputs, targets, hist_outputs, hist_targets, gamma)


def _rocstar_bwd(res, ct):
    outputs, targets, hist_outputs, hist_targets, gamma = res
    d_out = jax.grad(_rocstar_reference, argnums=0)(
        outputs, targets, hist_outputs, hist_targets, gamma) * ct
    # torch: gradients flow only to `outputs` (history is detached, targets are labels).
    return (d_out, jnp.zeros_like(targets), jnp.zeros_like(hist_outputs),
            jnp.zeros_like(hist_targets), jnp.zeros_like(gamma))


rocstar_loss_pallas.defvjp(_rocstar_fwd, _rocstar_bwd)


# --------------------------------------------------------------------------------------
# Gamma re-estimation (torch _update_gamma): exact selection without a full sort
# --------------------------------------------------------------------------------------
def _gamma_pairs(outputs_hist, targets_hist, delta):
    """Shared prologue replicating torch's f32 arithmetic for the target index."""
    oh = outputs_hist.reshape(-1).astype(jnp.float32)
    th = targets_hist.reshape(-1)
    pos = th > 0
    neg = th < 1
    diff = oh[:, None] - oh[None, :]                 # positive_i - negative_j candidates
    valid = pos[:, None] & neg[None, :]
    correct = valid & (diff > 0.0)
    n_pairs = jnp.sum(valid)
    n_correct = jnp.sum(correct)
    auc = n_correct.astype(jnp.float32) / jnp.maximum(n_pairs, 1).astype(jnp.float32)
    num_wrong = (jnp.float32(1.0) - auc) * n_pairs.astype(jnp.float32)
    idx = jnp.minimum(jnp.floor(num_wrong * jnp.float32(delta)).astype(jnp.int32),
                      n_correct.astype(jnp.int32) - 1)
    return diff, correct, idx


def _estimate_gamma(outputs_hist, targets_hist, gamma_old, delta):
    """idx-th smallest correctly-ordered diff via exact bisection on f32 bit patterns.

    All candidates are strictly positive floats, so their IEEE-754 bit patterns are
    value-ordered; 33 masked count-reduces pin down the exact order statistic (no sort).
    """
    diff, correct, idx = _gamma_pairs(outputs_hist, targets_hist, delta)
    vals = jnp.where(correct, diff, jnp.inf)

    def body(_, lohi):
        lo, hi = lohi
        mid = lo + (hi - lo) // 2
        t = lax.bitcast_convert_type(mid, jnp.float32)
        cnt = jnp.sum((vals <= t).astype(jnp.int32))
        go_hi = cnt >= idx + 1
        return (jnp.where(go_hi, lo, mid), jnp.where(go_hi, mid, hi))

    lo0 = jnp.int32(0)
    hi0 = jnp.int32(0x7F800000)                     # +inf bit pattern (upper bound)
    _, hi = lax.fori_loop(0, 33, body, (lo0, hi0))
    cand = lax.bitcast_convert_type(hi, jnp.float32)
    return jnp.where(idx >= 0, cand, gamma_old).astype(jnp.float32)


def _estimate_gamma_sort(outputs_hist, targets_hist, gamma_old, delta):
    """Torch-faithful sort-based selection (used only as a test reference)."""
    diff, correct, idx = _gamma_pairs(outputs_hist, targets_hist, delta)
    flat = jnp.sort(jnp.where(correct, diff, jnp.inf).reshape(-1))
    cand = flat[jnp.clip(idx, 0, flat.shape[0] - 1)]
    return jnp.where(idx >= 0, cand, gamma_old).astype(jnp.float32)


# --------------------------------------------------------------------------------------
# Stateful module: device-resident circular history, gamma, step counter
# --------------------------------------------------------------------------------------
class RocStarLossPallas:
    """JAX/Pallas port of catalyst RocStarLoss (pairwise ROC-AUC surrogate).

    All per-step state (gamma, step counter, circular history buffers, write pointer)
    is device resident and the whole forward step (degenerate-batch select, conditional
    gamma re-estimation, Pallas loss, circular history update) is one jitted function
    with the history buffers donated -> no host round-trips, in-place history update.
    """

    def __init__(self, delta: float = 1.0, sample_size: int = 16,
                 sample_size_gamma: int = 32, update_gamma_each: int = 5,
                 seed: int = 0):
        self.delta = float(delta)
        self.sample_size = sample_size
        self.sample_size_gamma = sample_size_gamma
        self.update_gamma_each = update_gamma_each
        size = max(sample_size, sample_size_gamma)
        self.buffer_size = size + 2

        key = jax.random.PRNGKey(seed)
        k1, k2 = jax.random.split(key)
        # Deterministic synthetic history (mirrors torch.rand / torch.randint init);
        # the trailing [0, 1] guarantees both classes are present initially.
        self.outputs_history = jax.random.uniform(k1, (size + 2, 1), dtype=jnp.float32)
        rand_labels = jax.random.randint(k2, (size, 1), 0, 2, dtype=jnp.int32)
        self.targets_history = jnp.concatenate(
            [rand_labels, jnp.array([[0], [1]], dtype=jnp.int32)], axis=0)
        # Circular-buffer write pointer (== index of the oldest logical element).
        self.ptr = jnp.asarray(0, dtype=jnp.int32)
        # torch keeps gamma=None until the first update; the first non-degenerate step
        # always re-estimates gamma before it is used, so 0.0 is a dead placeholder.
        self.gamma = jnp.asarray(0.0, dtype=jnp.float32)
        self.steps = jnp.asarray(0, dtype=jnp.int32)

        self._step = jax.jit(self._make_step_fn(), donate_argnums=(2, 3))

    def _make_step_fn(self):
        sample_size = self.sample_size
        gamma_size = self.sample_size_gamma
        n_hist = self.buffer_size
        update_each = self.update_gamma_each
        delta = self.delta

        def step(outputs, targets, out_hist, tgt_hist, ptr, gamma, steps):
            batch_size = outputs.shape[0]
            outputs_f = outputs.astype(jnp.float32)
            targets_f = targets.astype(jnp.float32)
            t_sum = jnp.sum(targets_f)
            degenerate = jnp.logical_or(t_sum == 0.0, t_sum == jnp.float32(batch_size))

            def last(buf, k):
                # Last k logical entries (oldest -> newest) of the circular buffer.
                idx = (ptr - k + jnp.arange(k, dtype=jnp.int32)) % n_hist
                return buf[idx]

            def degenerate_branch():
                # torch early-returns: no gamma update, no step increment, no roll.
                return (jnp.sum(outputs_f) * jnp.float32(1e-8),
                        out_hist, tgt_hist, ptr, gamma, steps)

            def active_branch():
                new_gamma = lax.cond(
                    steps % update_each == 0,
                    lambda: _estimate_gamma(last(out_hist, gamma_size),
                                            last(tgt_hist, gamma_size), gamma, delta),
                    lambda: gamma)
                loss = rocstar_loss_pallas(
                    outputs_f, targets_f,
                    last(out_hist, sample_size),
                    last(tgt_hist, sample_size).astype(jnp.float32),
                    new_gamma)
                # Circular write of the current batch (in place on the donated buffers).
                widx = (ptr + jnp.arange(batch_size, dtype=jnp.int32)) % n_hist
                new_out_hist = out_hist.at[widx].set(outputs_f)
                new_tgt_hist = tgt_hist.at[widx].set(targets.astype(jnp.int32))
                new_ptr = (ptr + batch_size) % n_hist
                return (loss, new_out_hist, new_tgt_hist, new_ptr, new_gamma, steps + 1)

            return lax.cond(degenerate, degenerate_branch, active_branch)

        return step

    def __call__(self, outputs, targets):
        if outputs.shape != targets.shape:
            raise ValueError(f"Shape mismatch: {outputs.shape}, {targets.shape}")
        (loss, self.outputs_history, self.targets_history,
         self.ptr, self.gamma, self.steps) = self._step(
            outputs, targets, self.outputs_history, self.targets_history,
            self.ptr, self.gamma, self.steps)
        return loss


# --------------------------------------------------------------------------------------
# Self-test
# --------------------------------------------------------------------------------------
if __name__ == "__main__":
    B, S, SG = 8, 16, 32
    key = jax.random.PRNGKey(0)
    k_out, k_tgt, k_h, k_ht, k_loop = jax.random.split(key, 5)

    # ---- standalone kernel vs pure-jnp reference (moment expansion re-validated) ----
    outputs = jax.random.uniform(k_out, (B, 1), dtype=jnp.float32)
    targets = jax.random.bernoulli(k_tgt, 0.5, (B, 1)).astype(jnp.float32)
    targets = targets.at[0, 0].set(1.0).at[1, 0].set(0.0)       # ensure mixed labels
    hist_o = jax.random.uniform(k_h, (S, 1), dtype=jnp.float32)
    hist_t = jax.random.bernoulli(k_ht, 0.5, (S, 1)).astype(jnp.float32)
    hist_t = hist_t.at[0, 0].set(1.0).at[1, 0].set(0.0)
    gamma0 = jnp.float32(0.35)
    got = rocstar_loss_pallas(outputs, targets, hist_o, hist_t, gamma0)
    want = _rocstar_reference(outputs, targets, hist_o, hist_t, gamma0)
    jax.block_until_ready((got, want))
    assert bool(jnp.allclose(got, want, rtol=1e-5, atol=1e-6)), (got, want)

    # ---- backward path smoke test (custom_vjp) ----
    grad_out = jax.grad(
        lambda o: rocstar_loss_pallas(o, targets, hist_o, hist_t, gamma0))(outputs)
    jax.block_until_ready(grad_out)
    assert grad_out.shape == outputs.shape and bool(jnp.all(jnp.isfinite(grad_out)))

    # ---- gamma estimator: exact bisection selection vs sort-based selection ----
    criterion = RocStarLossPallas(sample_size=S, sample_size_gamma=SG,
                                  update_gamma_each=5, seed=0)
    init_out = criterion.outputs_history + 0.0     # copies (state buffers get donated)
    init_tgt = criterion.targets_history + 0
    g_bisect = _estimate_gamma(init_out[-SG:], init_tgt[-SG:], jnp.float32(-1.0),
                               criterion.delta)
    g_sort = _estimate_gamma_sort(init_out[-SG:], init_tgt[-SG:], jnp.float32(-1.0),
                                  criterion.delta)
    assert bool(jnp.allclose(g_bisect, g_sort, rtol=0.0, atol=1e-6)), (g_bisect, g_sort)

    # ---- multi-step stateful check against a torch-style reference loop ----
    # Covers: first gamma update, degenerate early return, circular gather/scatter wrap,
    # and a second gamma update on a history containing wrapped model outputs.
    ref_out_hist, ref_tgt_hist = init_out, init_tgt
    ref_gamma = jnp.float32(0.0)
    ref_steps = 0
    n_steps = 7
    step_keys = jax.random.split(k_loop, n_steps)
    for i in range(n_steps):
        ko, kt = jax.random.split(step_keys[i])
        o_i = jax.random.uniform(ko, (B, 1), dtype=jnp.float32)
        if i == 3:
            t_i = jnp.ones((B, 1), dtype=jnp.float32)            # degenerate batch
        else:
            t_i = jax.random.bernoulli(kt, 0.5, (B, 1)).astype(jnp.float32)
            t_i = t_i.at[0, 0].set(1.0).at[1, 0].set(0.0)

        loss_i = criterion(o_i, t_i)

        t_sum = float(jnp.sum(t_i))
        if t_sum == 0.0 or t_sum == float(B):
            ref_loss = jnp.sum(o_i) * jnp.float32(1e-8)
        else:
            if ref_steps % criterion.update_gamma_each == 0:
                ref_gamma = _estimate_gamma_sort(ref_out_hist[-SG:], ref_tgt_hist[-SG:],
                                                 ref_gamma, criterion.delta)
            ref_steps += 1
            ref_loss = _rocstar_reference(o_i, t_i, ref_out_hist[-S:],
                                          ref_tgt_hist[-S:].astype(jnp.float32),
                                          ref_gamma)
            ref_out_hist = jnp.concatenate([ref_out_hist[B:], o_i], axis=0)
            ref_tgt_hist = jnp.concatenate([ref_tgt_hist[B:], t_i.astype(jnp.int32)],
                                           axis=0)
        assert bool(jnp.allclose(loss_i, ref_loss, rtol=1e-4, atol=1e-5)), (
            i, loss_i, ref_loss)

    jax.block_until_ready(loss_i)
    print("KERNEL_OK")
</pallas_src>

<mosaic_0001>
module attributes {stable_mosaic.version = 11 : i64} {
  func.func @_rocstar_kernel(%arg0: memref<2x8xf32, #tpu.memory_space<vmem>>, %arg1: memref<16x3xf32, #tpu.memory_space<vmem>>, %arg2: memref<1x1xf32, #tpu.memory_space<vmem>>) attributes {dimension_semantics = [], scalar_prefetch = 0 : i64, scratch_operands = 0 : i64, tpu.core_type = #tpu.core_type<tc>} {
    %c0 = arith.constant 0 : index
    %c0_0 = arith.constant 0 : index
    %0 = vector.load %arg0[%c0, %c0_0] : memref<2x8xf32, #tpu.memory_space<vmem>>, vector<1x8xf32>
    %c1 = arith.constant 1 : index
    %c0_1 = arith.constant 0 : index
    %1 = vector.load %arg0[%c1, %c0_1] : memref<2x8xf32, #tpu.memory_space<vmem>>, vector<1x8xf32>
    %c0_2 = arith.constant 0 : index
    %c0_3 = arith.constant 0 : index
    %2 = vector.load %arg1[%c0_2, %c0_3] : memref<16x3xf32, #tpu.memory_space<vmem>>, vector<16x1xf32>
    %c0_4 = arith.constant 0 : index
    %c1_5 = arith.constant 1 : index
    %3 = vector.load %arg1[%c0_4, %c1_5] : memref<16x3xf32, #tpu.memory_space<vmem>>, vector<16x1xf32>
    %c0_6 = arith.constant 0 : index
    %c2 = arith.constant 2 : index
    %4 = vector.load %arg1[%c0_6, %c2] : memref<16x3xf32, #tpu.memory_space<vmem>>, vector<16x1xf32>
    %cst = arith.constant 0.000000e+00 : f32
    %5 = vector.broadcast %cst : f32 to vector<1x8xf32>
    %6 = arith.cmpf ogt, %1, %5 : vector<1x8xf32>
    %7 = arith.extui %6 : vector<1x8xi1> to vector<1x8xi32>
    %8 = arith.sitofp %7 : vector<1x8xi32> to vector<1x8xf32>
    %cst_7 = arith.constant 1.000000e+00 : f32
    %9 = vector.broadcast %cst_7 : f32 to vector<1x8xf32>
    %10 = arith.cmpf olt, %1, %9 : vector<1x8xf32>
    %11 = arith.extui %10 : vector<1x8xi1> to vector<1x8xi32>
    %12 = arith.sitofp %11 : vector<1x8xi32> to vector<1x8xf32>
    %cst_8 = arith.constant 0.000000e+00 : f32
    %13 = vector.broadcast %cst_8 : f32 to vector<16x1xf32>
    %14 = arith.cmpf ogt, %3, %13 : vector<16x1xf32>
    %15 = arith.extui %14 : vector<16x1xi1> to vector<16x1xi32>
    %16 = arith.sitofp %15 : vector<16x1xi32> to vector<16x1xf32>
    %cst_9 = arith.constant 1.000000e+00 : f32
    %17 = vector.broadcast %cst_9 : f32 to vector<16x1xf32>
    %18 = arith.cmpf olt, %3, %17 : vector<16x1xf32>
    %19 = arith.extui %18 : vector<16x1xi1> to vector<16x1xi32>
    %20 = arith.sitofp %19 : vector<16x1xi32> to vector<16x1xf32>
    %21 = arith.mulf %8, %0 : vector<1x8xf32>
    %22 = arith.mulf %12, %0 : vector<1x8xf32>
    %cst_10 = arith.constant dense<0.000000e+00> : vector<1xf32>
    %23 = vector.multi_reduction <add>, %8, %cst_10 [1] : vector<1x8xf32> to vector<1xf32>
    %24 = vector.shape_cast %23 : vector<1xf32> to vector<1x1xf32>
    %cst_11 = arith.constant dense<0.000000e+00> : vector<1xf32>
    %25 = vector.multi_reduction <add>, %21, %cst_11 [1] : vector<1x8xf32> to vector<1xf32>
    %26 = vector.shape_cast %25 : vector<1xf32> to vector<1x1xf32>
    %27 = arith.mulf %21, %0 : vector<1x8xf32>
    %cst_12 = arith.constant dense<0.000000e+00> : vector<1xf32>
    %28 = vector.multi_reduction <add>, %27, %cst_12 [1] : vector<1x8xf32> to vector<1xf32>
    %29 = vector.shape_cast %28 : vector<1xf32> to vector<1x1xf32>
    %cst_13 = arith.constant dense<0.000000e+00> : vector<1xf32>
    %30 = vector.multi_reduction <add>, %12, %cst_13 [1] : vector<1x8xf32> to vector<1xf32>
    %31 = vector.shape_cast %30 : vector<1xf32> to vector<1x1xf32>
    %cst_14 = arith.constant dense<0.000000e+00> : vector<1xf32>
    %32 = vector.multi_reduction <add>, %22, %cst_14 [1] : vector<1x8xf32> to vector<1xf32>
    %33 = vector.shape_cast %32 : vector<1xf32> to vector<1x1xf32>
    %34 = arith.mulf %22, %0 : vector<1x8xf32>
    %cst_15 = arith.constant dense<0.000000e+00> : vector<1xf32>
    %35 = vector.multi_reduction <add>, %34, %cst_15 [1] : vector<1x8xf32> to vector<1xf32>
    %36 = vector.shape_cast %35 : vector<1xf32> to vector<1x1xf32>
    %37 = arith.addf %2, %4 : vector<16x1xf32>
    %38 = arith.subf %4, %2 : vector<16x1xf32>
    %39 = arith.mulf %20, %37 : vector<16x1xf32>
    %40 = arith.mulf %16, %38 : vector<16x1xf32>
    %cst_16 = arith.constant dense<0.000000e+00> : vector<1xf32>
    %41 = vector.multi_reduction <add>, %20, %cst_16 [0] : vector<16x1xf32> to vector<1xf32>
    %42 = vector.shape_cast %41 : vector<1xf32> to vector<1x1xf32>
    %cst_17 = arith.constant dense<0.000000e+00> : vector<1xf32>
    %43 = vector.multi_reduction <add>, %39, %cst_17 [0] : vector<16x1xf32> to vector<1xf32>
    %44 = vector.shape_cast %43 : vector<1xf32> to vector<1x1xf32>
    %45 = arith.mulf %39, %37 : vector<16x1xf32>
    %cst_18 = arith.constant dense<0.000000e+00> : vector<1xf32>
    %46 = vector.multi_reduction <add>, %45, %cst_18 [0] : vector<16x1xf32> to vector<1xf32>
    %47 = vector.shape_cast %46 : vector<1xf32> to vector<1x1xf32>
    %cst_19 = arith.constant dense<0.000000e+00> : vector<1xf32>
    %48 = vector.multi_reduction <add>, %16, %cst_19 [0] : vector<16x1xf32> to vector<1xf32>
    %49 = vector.shape_cast %48 : vector<1xf32> to vector<1x1xf32>
    %cst_20 = arith.constant dense<0.000000e+00> : vector<1xf32>
    %50 = vector.multi_reduction <add>, %40, %cst_20 [0] : vector<16x1xf32> to vector<1xf32>
    %51 = vector.shape_cast %50 : vector<1xf32> to vector<1x1xf32>
    %52 = arith.mulf %40, %38 : vector<16x1xf32>
    %cst_21 = arith.constant dense<0.000000e+00> : vector<1xf32>
    %53 = vector.multi_reduction <add>, %52, %cst_21 [0] : vector<16x1xf32> to vector<1xf32>
    %54 = vector.shape_cast %53 : vector<1xf32> to vector<1x1xf32>
    %55 = arith.mulf %47, %24 : vector<1x1xf32>
    %cst_22 = arith.constant 2.000000e+00 : f32
    %56 = vector.broadcast %cst_22 : f32 to vector<1x1xf32>
    %57 = arith.mulf %56, %44 : vector<1x1xf32>
    %58 = arith.mulf %57, %26 : vector<1x1xf32>
    %59 = arith.subf %55, %58 : vector<1x1xf32>
    %60 = arith.mulf %42, %29 : vector<1x1xf32>
    %61 = arith.addf %59, %60 : vector<1x1xf32>
    %62 = arith.mulf %42, %24 : vector<1x1xf32>
    %63 = arith.mulf %54, %31 : vector<1x1xf32>
    %cst_23 = arith.constant 2.000000e+00 : f32
    %64 = vector.broadcast %cst_23 : f32 to vector<1x1xf32>
    %65 = arith.mulf %64, %51 : vector<1x1xf32>
    %66 = arith.mulf %65, %33 : vector<1x1xf32>
    %67 = arith.addf %63, %66 : vector<1x1xf32>
    %68 = arith.mulf %49, %36 : vector<1x1xf32>
    %69 = arith.addf %67, %68 : vector<1x1xf32>
    %70 = arith.mulf %49, %31 : vector<1x1xf32>
    %cst_24 = arith.constant 1.000000e+00 : f32
    %71 = vector.broadcast %cst_24 : f32 to vector<1x1xf32>
    %72 = arith.maximumf %62, %71 : vector<1x1xf32>
    %73 = arith.divf %61, %72 : vector<1x1xf32>
    %cst_25 = arith.constant 1.000000e+00 : f32
    %74 = vector.broadcast %cst_25 : f32 to vector<1x1xf32>
    %75 = arith.maximumf %70, %74 : vector<1x1xf32>
    %76 = arith.divf %69, %75 : vector<1x1xf32>
    %77 = arith.addf %73, %76 : vector<1x1xf32>
    %c0_26 = arith.constant 0 : index
    %c0_27 = arith.constant 0 : index
    %78 = vector.load %arg2[%c0_26, %c0_27] : memref<1x1xf32, #tpu.memory_space<vmem>>, vector<1x1xf32>
    tpu.vector_store %arg2[%c0_26, %c0_27], %77 {strides = array<i32>} : memref<1x1xf32, #tpu.memory_space<vmem>>, vector<1x1xf32>,
    return
  }
}

</mosaic_0001>

<bundles_post_ra>
// kernel: tpu_custom_call.1
= control target key start
LH: loop header
LB: loop body
LE: loop exit
PB: predicated region body
PF: predicated region fallthrough
CT: control target
= control target key end

     0   :  { %s233_s13 = smov 126   ;;  %s234_s14 = smov 2   ;;  %v235_v4 = vmov 0.0   ;;  %s295_s0 = inlined_call_operand.vmem [shape: f32[2,8], index: 0, kind: input, shape index: {}]   ;;  %s296_s1 = inlined_call_operand.vmem [shape: f32[16,3], index: 1, kind: input, shape index: {}]   ;;  %s297_s2 = inlined_call_operand.hbm [shape: f32[1,1], index: 2, kind: output, shape index: {}]  }
   0x1   :  { %v14_v0 = vld [vmem:[%s296_s1] sm:$0xff]  ;;  %v15_v3 = vld [vmem:[%s296_s1 + $0x8] sm:$0xff] }
   0x2   :  { %v13_v1 = vld [vmem:[%s295_s0 + $0x1] sm:$0x1]  ;;  %59 = vrot.lane.b32.xlu0 %v14_v0, %s233_s13  ;;  %67 = vrot.lane.b32.xlu1 %v14_v0, %s234_s14  ;;  %v12_v2 = vld [vmem:[%s295_s0] sm:$0x1] }
   0x3   :  { %vm16_vm0 = vcmp.gt.f32.partialorder %v13_v1, 0.0 }
   0x4   :  { %v195_v5 = vsel %vm16_vm0, 1.0, %v235_v4 }
   0x5   :  { %7 = vsyncpa [#allocation3], 0  ;;  %v34_v6 = vmul.f32 %v195_v5, %v12_v2  ;;  %vm36_vm1 = vcmask 57344   ;;  %vm19_vm2 = vcmp.lt.f32.partialorder %v13_v1, 1.0  ;;  %s236_s0 = smov 1   ;;  %s237_s1 = smov 127  }
   0x6   :  { %61 = vrot.lane.b32.xlu0 %v15_v3, %s233_s13  ;;  %69 = vrot.lane.b32.xlu1 %v15_v3, %s234_s14  ;;  %v196_v9 = vsel %vm19_vm2, 1.0, %v235_v4  ;;  %v37_v12 = vsel %vm36_vm1, %v195_v5, 0.0  ;;  %vm28_vm3 = vcmp.lt.f32.partialorder %v14_v0, 1.0  ;;  %vm29_vm4 = vcmp.lt.f32.partialorder %v15_v3, 1.0  ;;  %s238_s19 = smov [#allocation2]  }
   0x7   :  { %v43_v7 = vmul.f32 %v34_v6, %v12_v2  ;;  %v35_v10 = vmul.f32 %v196_v9, %v12_v2  ;;  %v40_v15 = vsel %vm36_vm1, %v34_v6, 0.0  ;;  %v47_v16 = vsel %vm36_vm1, %v196_v9, 0.0  ;;  %s187_s20 = sshll.u32 %s238_s19, 4  ;;  %s188_s20 = int_to_ptr.vmem [resolvable:$true] %s187_s20 }
   0x8   :  { %vm22_vm5 = vcmp.gt.f32.partialorder %v14_v0, 0.0  ;;  %vm23_vm6 = vcmp.gt.f32.partialorder %v15_v3, 0.0  ;;  %v199_v28 = vsel %vm28_vm3, 1.0, %v235_v4  ;;  %v200_v29 = vsel %vm29_vm4, 1.0, %v235_v4  ;;  %s211_s21 = scalar_lea.vmem %s188_s20, 16  ;;  %s215_s22 = scalar_lea.vmem %s188_s20, 32 }
   0x9   :  { %v44_v8 = vsel %vm36_vm1, %v43_v7, 0.0  ;;  %v50_v11 = vsel %vm36_vm1, %v35_v10, 0.0  ;;  %v53_v13 = vmul.f32 %v35_v10, %v12_v2  ;;  %vm95_vm7 = vcmask 15368   ;;  %p212_p0 = scmp.ne.s32.totalorder %s188_s20, %s211_s21  ;;  %p216_p1 = scmp.lt.s32.totalorder %s188_s20, %s188_s20 }
   0xa   :  { %v197_v30 = vsel %vm22_vm5, 1.0, %v235_v4  ;;  %v198_v31 = vsel %vm23_vm6, 1.0, %v235_v4  ;;  %v96_v32 = vsel %vm95_vm7, %v199_v28, 0.0  ;;  %v97_v33 = vsel %vm95_vm7, %v200_v29, 0.0  ;;  %p217_p2 = scmp.lt.s32.totalorder %s215_s22, %s211_s21 }
   0xb   :  { %v54_v14 = vsel %vm36_vm1, %v53_v13, 0.0  ;;  %v125_v35 = vsel %vm95_vm7, %v197_v30, 0.0  ;;  %v126_v36 = vsel %vm95_vm7, %v198_v31, 0.0  ;;  %v98_v38 = vadd.f32 %v97_v33, %v96_v32 }
   0xc   :  { %v127_v39 = vadd.f32 %v126_v36, %v125_v35  ;;  %vm179_vm8 = vcmask 0   ;;  %p218_p3 = por %p217_p2, %p216_p1 }
   0xd   :  { %v99_v42 = vrot.slane %v98_v38, 4 }
   0xe   :  { %v128_v44 = vrot.slane %v127_v39, 4  ;;  %p219_p4 = pnand %p218_p3, %p212_p0 }
   0xf   :  { %v100_v49 = vadd.f32 %v99_v42, %v98_v38 }
  0x10   :  { %v129_v53 = vadd.f32 %v128_v44, %v127_v39 }
  0x11   :  { %v101_v57 = vrot.slane %v100_v49, 2 }
  0x12   :  { %v130_v61 = vrot.slane %v129_v53, 2 }
  0x14   :  { %v131_v5 = vadd.f32 %v130_v61, %v129_v53 }
  0x25   :  { %38 = vadd.xlane.f32.xlu0 %v37_v12 }
  0x29   :  { %41 = vadd.xlane.f32.xlu0 %v40_v15 }
  0x2a   :  { %48 = vadd.xlane.f32.xlu1 %v47_v16 }
  0x74   :  { %v60_v17 = vpop.permute.xlu0 %59  ;;  %v68_v18 = vpop.permute.xlu1 %67 }
  0x75   :  { %v65_v19 = vadd.f32 %v60_v17, %v14_v0  ;;  %v73_v20 = vsub.f32 %v14_v0, %v68_v18 }
  0x77   :  { %77 = vrot.lane.b32.xlu0 %v65_v19, %s236_s0 }
  0x78   :  { %v62_v21 = vpop.permute.xlu0 %61  ;;  %v70_v22 = vpop.permute.xlu1 %69 }
  0x79   :  { %v66_v23 = vadd.f32 %v62_v21, %v15_v3  ;;  %v74_v24 = vsub.f32 %v15_v3, %v70_v22  ;;  %v102_v3 = vadd.f32 %v101_v57, %v100_v49 }
  0x7b   :  { %79 = vrot.lane.b32.xlu1 %v66_v23, %s236_s0  ;;  %87 = vrot.lane.b32.xlu0 %v73_v20, %s237_s1  ;;  %v103_v10 = vrot.slane %v102_v3, 1 }
  0x7d   :  { %v104_v16 = vadd.f32 %v103_v10, %v102_v3 }
  0x7f   :  { %89 = vrot.lane.b32.xlu1 %v74_v24, %s237_s1 }
  0x9a   :  { %45 = vadd.xlane.f32.xlu0 %v44_v8 }
  0x9e   :  { %55 = vadd.xlane.f32.xlu0 %v54_v14 }
  0xa3   :  { %51 = vadd.xlane.f32.xlu1 %v50_v11  ;;  %v132_v11 = vrot.slane %v131_v5, 1 }
  0xa5   :  { %v133_v17 = vadd.f32 %v132_v11, %v131_v5 }
  0xae   :  { %v268_v25 = vpop.xlane.xlu0 %38 }
  0xaf   :  { %v160_v22 = vmul.f32 %v104_v16, %v268_v25 }
  0xb2   :  { %v272_v27 = vpop.xlane.xlu0 %41 }
  0xb3   :  { %v270_v26 = vpop.xlane.xlu1 %48 }
  0xb4   :  { %v167_v23 = vmul.f32 %v133_v17, %v270_v26 }
  0xb6   :  { %v171_v32 = vmax.f32 %v167_v23, 1.0 }
  0xe9   :  { %v78_v37 = vpop.permute.xlu0 %77 }
  0xea   :  { %v83_v43 = vmul.f32 %v199_v28, %v78_v37 }
  0xec   :  { %v105_v50 = vsel %vm95_vm7, %v83_v43, 0.0  ;;  %v114_v51 = vmul.f32 %v83_v43, %v78_v37 }
  0xed   :  { %v80_v34 = vpop.permute.xlu1 %79  ;;  %v88_v45 = vpop.permute.xlu0 %87 }
  0xee   :  { %v84_v40 = vmul.f32 %v200_v29, %v80_v34  ;;  %v93_v52 = vmul.f32 %v197_v30, %v88_v45  ;;  %v116_v58 = vsel %vm95_vm7, %v114_v51, 0.0 }
  0xf0   :  { %v106_v46 = vsel %vm95_vm7, %v84_v40, 0.0  ;;  %v115_v47 = vmul.f32 %v84_v40, %v80_v34  ;;  %v143_v59 = vmul.f32 %v93_v52, %v88_v45  ;;  %v134_v0 = vsel %vm95_vm7, %v93_v52, 0.0 }
  0xf1   :  { %v90_v41 = vpop.permute.xlu1 %89  ;;  %v107_v54 = vadd.f32 %v106_v46, %v105_v50 }
  0xf2   :  { %v94_v48 = vmul.f32 %v198_v31, %v90_v41  ;;  %v117_v55 = vsel %vm95_vm7, %v115_v47, 0.0  ;;  %v145_v4 = vsel %vm95_vm7, %v143_v59, 0.0  ;;  %v168_v31 = vmax.f32 %v160_v22, 1.0 }
  0xf3   :  { %v108_v62 = vrot.slane %v107_v54, 4  ;;  %v118_v63 = vadd.f32 %v117_v55, %v116_v58 }
  0xf4   :  { %v144_v56 = vmul.f32 %v94_v48, %v90_v41  ;;  %v135_v60 = vsel %vm95_vm7, %v94_v48, 0.0  ;;  %207 = vrcp.f32 %v168_v31 }
  0xf5   :  { %v136_v2 = vadd.f32 %v135_v60, %v134_v0  ;;  %v109_v6 = vadd.f32 %v108_v62, %v107_v54  ;;  %v119_v7 = vrot.slane %v118_v63, 4  ;;  %209 = vrcp.f32 %v171_v32 }
  0xf6   :  { %v146_v1 = vsel %vm95_vm7, %v144_v56, 0.0 }
  0xf7   :  { %v147_v8 = vadd.f32 %v146_v1, %v145_v4  ;;  %v137_v9 = vrot.slane %v136_v2, 4  ;;  %v110_v12 = vrot.slane %v109_v6, 2  ;;  %v120_v13 = vadd.f32 %v119_v7, %v118_v63 }
  0xf9   :  { %v148_v14 = vrot.slane %v147_v8, 4  ;;  %v138_v15 = vadd.f32 %v137_v9, %v136_v2  ;;  %v111_v18 = vadd.f32 %v110_v12, %v109_v6  ;;  %v121_v19 = vrot.slane %v120_v13, 2 }
  0xfb   :  { %v149_v20 = vadd.f32 %v148_v14, %v147_v8  ;;  %v139_v21 = vrot.slane %v138_v15, 2  ;;  %v112_v24 = vrot.slane %v111_v18, 1  ;;  %v122_v28 = vadd.f32 %v121_v19, %v120_v13 }
  0xfd   :  { %v150_v29 = vrot.slane %v149_v20, 2  ;;  %v140_v30 = vadd.f32 %v139_v21, %v138_v15  ;;  %v113_v33 = vadd.f32 %v112_v24, %v111_v18  ;;  %v123_v34 = vrot.slane %v122_v28, 1 }
  0xff   :  { %v151_v35 = vadd.f32 %v150_v29, %v149_v20  ;;  %v141_v36 = vrot.slane %v140_v30, 1  ;;  %v124_v37 = vadd.f32 %v123_v34, %v122_v28  ;;  %v155_v38 = vmul.f32 2.0, %v113_v33 }
 0x101   :  { %v152_v39 = vrot.slane %v151_v35, 1  ;;  %v142_v41 = vadd.f32 %v141_v36, %v140_v30  ;;  %v154_v42 = vmul.f32 %v124_v37, %v268_v25  ;;  %v156_v43 = vmul.f32 %v155_v38, %v272_v27  ;;  %v208_v55 = vpop.eup %207 }
 0x102   :  { %v210_v57 = vpop.eup %209 }
 0x103   :  { %v153_v44 = vadd.f32 %v152_v39, %v151_v35  ;;  %v162_v47 = vmul.f32 2.0, %v142_v41  ;;  %v157_v49 = vsub.f32 %v154_v42, %v156_v43 }
 0x105   :  { %v161_v50 = vmul.f32 %v153_v44, %v270_v26 }
 0x123   :  { %v46_v40 = vpop.xlane.xlu0 %45 }
 0x124   :  { %v158_v46 = vmul.f32 %v104_v16, %v46_v40 }
 0x126   :  { %v159_v53 = vadd.f32 %v158_v46, %v157_v49 }
 0x127   :  { %v56_v45 = vpop.xlane.xlu0 %55 }
 0x128   :  { %v165_v52 = vmul.f32 %v133_v17, %v56_v45  ;;  %v170_v58 = vmul.f32 %v208_v55, %v159_v53 }
 0x12c   :  { %v52_v48 = vpop.xlane.xlu1 %51 }
 0x12d   :  { %v163_v51 = vmul.f32 %v162_v47, %v52_v48 }
 0x12f   :  { %v164_v54 = vadd.f32 %v163_v51, %v161_v50 }
 0x131   :  { %v166_v56 = vadd.f32 %v165_v52, %v164_v54 }
 0x133   :  { %v173_v59 = vmul.f32 %v210_v57, %v166_v56 }
 0x135   :  { %v174_v25 = vadd.f32 %v173_v59, %v170_v58 }
 0x137   :  { %176 = vrot.lane.b32.xlu1 %v174_v25, %s237_s1 }
 0x1a9   :  { %v177_v27 = vpop.permute.xlu1 %176 }
 0x1aa   :  { %180 = vst.msk [vmem:[#allocation2] sm:$0x1] %vm179_vm8, %v177_v27 }
 0x1ab   :  { %222 = shalt.err (!%p219_p4)
}
 0x1ac   :  { %190 = dma.vmem_to_hbm [thread:$0]  %s188_s20, 16, %s297_s2, [#allocation3]  }
 0x1ad   :  { %231 = dma.done.wait [#allocation3], 16  }
 0x1ae   :  { %232 = vsyncadd [#allocation3], 4294967280 }
 0x1af   :  { %194 = vsyncpa [#allocation3], 1 }

</bundles_post_ra>
